<compile_context>
chip_gen: v6e
topology: v6e:2x2x1
jax: 0.10.0
libtpu: 0.0.40
codegen_flags: <defaults>
</compile_context>

<pallas_src>
import jax
import jax.numpy as jnp
from jax.experimental import pallas as pl
from jax.experimental.pallas import tpu as pltpu

D_IN, D_HID, D_OUT = 1024, 256, 10
D_OUT_PAD = 128  # lane-dense output slab


def _round_up(n, m):
    return ((n + m - 1) // m) * m


def fully_connec_kernel(x_ref, w2_ref, b2_ref, w3_ref, b3_ref, o_ref):
    # relu(x)  (dropout is identity in eval mode) — f32 on the VPU.
    x = jnp.maximum(x_ref[...], 0.0)

    # fc2: (TB,1024) @ (1024,256) on the MXU with bf16 operands, f32 accum.
    h = jnp.dot(
        x.astype(jnp.bfloat16), w2_ref[...], preferred_element_type=jnp.float32
    )
    h = jnp.maximum(h + b2_ref[...], 0.0)

    # fc3: (TB,256) @ (256,128) (output lane-padded 10->128), f32 accum.
    o = jnp.dot(
        h.astype(jnp.bfloat16), w3_ref[...], preferred_element_type=jnp.float32
    )
    o_ref[...] = (o + b3_ref[...]).astype(o_ref.dtype)


def fully_connec(x, w2, b2, w3, b3, *, tile_b=None):
    """x: (B, 1024) f32; w2: (1024, 256); b2: (256,); w3: (256, 10); b3: (10,)."""
    B = x.shape[0]
    assert x.shape == (B, D_IN)

    # Batch tile: multiple of 8 (f32 sublane), capped at 1024 rows so the
    # double-buffered x tile stays well inside v7x's scoped VMEM.
    if tile_b is None:
        tile_b = min(1024, _round_up(max(B, 8), 8))
    TB = _round_up(tile_b, 8)
    B_pad = _round_up(max(B, TB), TB)
    if B_pad != B:
        x = jnp.pad(x, ((0, B_pad - B), (0, 0)))

    # Weights as bf16 MXU operands; biases as f32 rows; pad fc3 out-dim to 128.
    w2_bf = w2.astype(jnp.bfloat16)
    w3_bf = jnp.zeros((D_HID, D_OUT_PAD), jnp.bfloat16)
    w3_bf = w3_bf.at[:, :D_OUT].set(w3.astype(jnp.bfloat16))
    b2_row = b2.reshape(1, D_HID).astype(jnp.float32)
    b3_row = jnp.zeros((1, D_OUT_PAD), jnp.float32).at[:, :D_OUT].set(b3)

    grid = (B_pad // TB,)

    flops = 2 * B_pad * (D_IN * D_HID + D_HID * D_OUT_PAD)
    bytes_accessed = (
        B_pad * D_IN * 4                # x
        + D_IN * D_HID * 2              # w2 (bf16)
        + D_HID * D_OUT_PAD * 2         # w3 (bf16, padded)
        + (D_HID + D_OUT_PAD) * 4       # biases
        + B_pad * D_OUT_PAD * 4         # output slab
    )

    out = pl.pallas_call(
        fully_connec_kernel,
        out_shape=jax.ShapeDtypeStruct((B_pad, D_OUT_PAD), jnp.float32),
        grid=grid,
        in_specs=[
            pl.BlockSpec((TB, D_IN), lambda i: (i, 0)),           # x tile
            pl.BlockSpec((D_IN, D_HID), lambda i: (0, 0)),        # w2 resident
            pl.BlockSpec((1, D_HID), lambda i: (0, 0)),           # b2 resident
            pl.BlockSpec((D_HID, D_OUT_PAD), lambda i: (0, 0)),   # w3 resident
            pl.BlockSpec((1, D_OUT_PAD), lambda i: (0, 0)),       # b3 resident
        ],
        out_specs=pl.BlockSpec((TB, D_OUT_PAD), lambda i: (i, 0)),
        compiler_params=pltpu.CompilerParams(
            dimension_semantics=("parallel",),
        ),
        cost_estimate=pl.CostEstimate(
            flops=flops, transcendentals=0, bytes_accessed=bytes_accessed
        ),
    )(x, w2_bf, b2_row, w3_bf, b3_row)

    return out[:B, :D_OUT]


def init_params(key):
    """Deterministic init mimicking torch.nn.Linear default: U(-1/sqrt(in), 1/sqrt(in))."""
    k1, k2, k3, k4 = jax.random.split(key, 4)
    bound2 = 1.0 / jnp.sqrt(1024.0)
    bound3 = 1.0 / jnp.sqrt(256.0)
    # Stored as (in, out) — i.e. already transposed relative to PyTorch's (out, in).
    w2 = jax.random.uniform(k1, (1024, 256), jnp.float32, -bound2, bound2)
    b2 = jax.random.uniform(k2, (256,), jnp.float32, -bound2, bound2)
    w3 = jax.random.uniform(k3, (256, 10), jnp.float32, -bound3, bound3)
    b3 = jax.random.uniform(k4, (10,), jnp.float32, -bound3, bound3)
    return w2, b2, w3, b3


def reference(x, w2, b2, w3, b3):
    h = jnp.maximum(x, 0.0)
    h = jnp.maximum(h @ w2 + b2, 0.0)
    return h @ w3 + b3


if __name__ == "__main__":
    key = jax.random.PRNGKey(0)
    kx, kp = jax.random.split(key)

    B = 8  # small batch; feature dims (1024, 256, 10) fixed by the module
    x = jax.random.normal(kx, (B, 1024), jnp.float32)
    w2, b2, w3, b3 = init_params(kp)

    out = fully_connec(x, w2, b2, w3, b3)
    out = jax.block_until_ready(out)

    ref = reference(x, w2, b2, w3, b3)
    assert out.shape == (B, 10)
    # bf16 MXU operands -> loosened tolerance vs. the f32 reference.
    assert jnp.allclose(out, ref, atol=5e-2, rtol=5e-2), "mismatch vs. reference"

    print("KERNEL_OK")
</pallas_src>

<mosaic_0001>
module attributes {stable_mosaic.version = 11 : i64} {
  func.func @fully_connec_kernel(%arg0: i32, %arg1: memref<8x1024xf32, #tpu.memory_space<vmem>>, %arg2: memref<1024x256xbf16, #tpu.memory_space<vmem>>, %arg3: memref<1x256xf32, #tpu.memory_space<vmem>>, %arg4: memref<256x128xbf16, #tpu.memory_space<vmem>>, %arg5: memref<1x128xf32, #tpu.memory_space<vmem>>, %arg6: memref<8x128xf32, #tpu.memory_space<vmem>>) attributes {dimension_semantics = [#tpu.dimension_semantics<parallel>], iteration_bounds = array<i64: 1>, scalar_prefetch = 0 : i64, scratch_operands = 0 : i64, tpu.core_type = #tpu.core_type<tc>, window_params = [{transform_indices = @transform_0, window_bounds = array<i64: 8, 1024>}, {pipeline_mode = #tpu.pipeline_mode<synchronous>, transform_indices = @transform_1, window_bounds = array<i64: 1024, 256>}, {pipeline_mode = #tpu.pipeline_mode<synchronous>, transform_indices = @transform_2, window_bounds = array<i64: 1, 256>}, {pipeline_mode = #tpu.pipeline_mode<synchronous>, transform_indices = @transform_3, window_bounds = array<i64: 256, 128>}, {pipeline_mode = #tpu.pipeline_mode<synchronous>, transform_indices = @transform_4, window_bounds = array<i64: 1, 128>}, {transform_indices = @transform_5, window_bounds = array<i64: 8, 128>}]} {
    %c0 = arith.constant 0 : index
    %c0_0 = arith.constant 0 : index
    %0 = vector.load %arg1[%c0, %c0_0] : memref<8x1024xf32, #tpu.memory_space<vmem>>, vector<8x1024xf32>
    %cst = arith.constant 0.000000e+00 : f32
    %1 = vector.broadcast %cst : f32 to vector<8x1024xf32>
    %2 = arith.maximumf %0, %1 : vector<8x1024xf32>
    %3 = arith.truncf %2 : vector<8x1024xf32> to vector<8x1024xbf16>
    %c0_1 = arith.constant 0 : index
    %c0_2 = arith.constant 0 : index
    %4 = vector.load %arg2[%c0_1, %c0_2] : memref<1024x256xbf16, #tpu.memory_space<vmem>>, vector<1024x256xbf16>
    %cst_3 = arith.constant dense<0.000000e+00> : vector<8x256xf32>
    %5 = tpu.matmul %3, %4, %cst_3 {dimension_numbers = #tpu.dot_dimension_numbers<[1], [0], [0], [1], [0, 0, 1, 1], [], []>} : vector<8x1024xbf16>, vector<1024x256xbf16>, vector<8x256xf32> -> vector<8x256xf32>
    %c0_4 = arith.constant 0 : index
    %c0_5 = arith.constant 0 : index
    %6 = vector.load %arg3[%c0_4, %c0_5] : memref<1x256xf32, #tpu.memory_space<vmem>>, vector<1x256xf32>
    %7 = vector.broadcast %6 : vector<1x256xf32> to vector<8x256xf32>
    %8 = arith.addf %5, %7 : vector<8x256xf32>
    %cst_6 = arith.constant 0.000000e+00 : f32
    %9 = vector.broadcast %cst_6 : f32 to vector<8x256xf32>
    %10 = arith.maximumf %8, %9 : vector<8x256xf32>
    %11 = arith.truncf %10 : vector<8x256xf32> to vector<8x256xbf16>
    %c0_7 = arith.constant 0 : index
    %c0_8 = arith.constant 0 : index
    %12 = vector.load %arg4[%c0_7, %c0_8] : memref<256x128xbf16, #tpu.memory_space<vmem>>, vector<256x128xbf16>
    %cst_9 = arith.constant dense<0.000000e+00> : vector<8x128xf32>
    %13 = tpu.matmul %11, %12, %cst_9 {dimension_numbers = #tpu.dot_dimension_numbers<[1], [0], [0], [1], [0, 0, 1, 1], [], []>} : vector<8x256xbf16>, vector<256x128xbf16>, vector<8x128xf32> -> vector<8x128xf32>
    %c0_10 = arith.constant 0 : index
    %c0_11 = arith.constant 0 : index
    %14 = vector.load %arg5[%c0_10, %c0_11] : memref<1x128xf32, #tpu.memory_space<vmem>>, vector<1x128xf32>
    %15 = vector.broadcast %14 : vector<1x128xf32> to vector<8x128xf32>
    %16 = arith.addf %13, %15 : vector<8x128xf32>
    %c0_12 = arith.constant 0 : index
    %c0_13 = arith.constant 0 : index
    %17 = vector.load %arg6[%c0_12, %c0_13] : memref<8x128xf32, #tpu.memory_space<vmem>>, vector<8x128xf32>
    tpu.vector_store %arg6[%c0_12, %c0_13], %16 {strides = array<i32>} : memref<8x128xf32, #tpu.memory_space<vmem>>, vector<8x128xf32>,
    return
  }
  func.func @transform_0(%arg0: i32) -> (i32, i32) {
    %c0_i32 = arith.constant 0 : i32
    %c0_i32_0 = arith.constant 0 : i32
    return %arg0, %c0_i32 : i32, i32
  }
  func.func @transform_1(%arg0: i32) -> (i32, i32) {
    %c0_i32 = arith.constant 0 : i32
    %c0_i32_0 = arith.constant 0 : i32
    %c0_i32_1 = arith.constant 0 : i32
    return %c0_i32, %c0_i32_0 : i32, i32
  }
  func.func @transform_2(%arg0: i32) -> (i32, i32) {
    %c0_i32 = arith.constant 0 : i32
    %c0_i32_0 = arith.constant 0 : i32
    %c0_i32_1 = arith.constant 0 : i32
    return %c0_i32, %c0_i32_0 : i32, i32
  }
  func.func @transform_3(%arg0: i32) -> (i32, i32) {
    %c0_i32 = arith.constant 0 : i32
    %c0_i32_0 = arith.constant 0 : i32
    %c0_i32_1 = arith.constant 0 : i32
    return %c0_i32, %c0_i32_0 : i32, i32
  }
  func.func @transform_4(%arg0: i32) -> (i32, i32) {
    %c0_i32 = arith.constant 0 : i32
    %c0_i32_0 = arith.constant 0 : i32
    %c0_i32_1 = arith.constant 0 : i32
    return %c0_i32, %c0_i32_0 : i32, i32
  }
  func.func @transform_5(%arg0: i32) -> (i32, i32) {
    %c0_i32 = arith.constant 0 : i32
    %c0_i32_0 = arith.constant 0 : i32
    return %arg0, %c0_i32 : i32, i32
  }
}

</mosaic_0001>

<bundles_post_ra>
// kernel: tpu_custom_call.1
= control target key start
LH: loop header
LB: loop body
LE: loop exit
PB: predicated region body
PF: predicated region fallthrough
CT: control target
= control target key end

     0   :  { %10 = vsyncpa [#allocation3], 0  ;;  %s1750_s0 = inlined_call_operand.hbm [shape: f32[8,1024], index: 0, kind: input, shape index: {}]   ;;  %s1751_s1 = inlined_call_operand.hbm [shape: bf16[1024,256], index: 1, kind: input, shape index: {}]   ;;  %s1752_s2 = inlined_call_operand.vmem [shape: f32[1,256], index: 2, kind: input, shape index: {}]   ;;  %s1753_s3 = inlined_call_operand.hbm [shape: bf16[256,128], index: 3, kind: input, shape index: {}]   ;;  %s1754_s4 = inlined_call_operand.vmem [shape: f32[1,128], index: 4, kind: input, shape index: {}]   ;;  %s1755_s5 = inlined_call_operand.hbm [shape: f32[8,128], index: 5, kind: output, shape index: {}]  }
   0x1   :  { %11 = vsyncpa [#allocation6], 0 }
   0x2   :  { %12 = vsyncpa [#allocation4], 0  ;;  %s1694_s18 = smov [#allocation5]  }
   0x3   :  { %s28_s19 = sshll.u32 %s1694_s18, 4  ;;  %s29_s19 = int_to_ptr.vmem [resolvable:$true] %s28_s19 }
   0x4   :  { %s1616_s20 = scalar_lea.vmem %s29_s19, 16384  ;;  %p1621_p1 = scmp.lt.s32.totalorder %s29_s19, %s29_s19 }
   0x5   :  { %p1617_p0 = scmp.ne.s32.totalorder %s29_s19, %s1616_s20  ;;  %p1622_p2 = scmp.lt.s32.totalorder %s1616_s20, %s1616_s20 }
   0x7   :  { %p1623_p3 = por %p1622_p2, %p1621_p1 }
   0x9   :  { %p1624_p4 = pnand %p1623_p3, %p1617_p0 }
   0xb   :  { %1627 = shalt.err (!%p1624_p4)
}
   0xc   :  { %s1695_s21 = smov 128   ;;  %s1696_s22 = smov 8  }
   0xd   :  { %34 = dma.hbm_to_vmem [thread:$0]  %s1751_s1, 16384, %s29_s19, [#allocation6], %s1695_s21, %s1695_s21, %s1696_s22  }
   0xe   :  { %s1697_s25 = smov [#allocation2]   ;;  %s1698_s27 = smov [#allocation7]  }
   0xf   :  { %s19_s26 = sshll.u32 %s1697_s25, 4  ;;  %s42_s28 = sshll.u32 %s1698_s27, 4  ;;  %s20_s26 = int_to_ptr.vmem [resolvable:$true] %s19_s26  ;;  %s43_s28 = int_to_ptr.vmem [resolvable:$true] %s42_s28 }
  0x10   :  { %s1636_s29 = scalar_lea.vmem %s20_s26, 1024  ;;  %p1641_p6 = scmp.lt.s32.totalorder %s20_s26, %s20_s26 }
  0x11   :  { %p1637_p5 = scmp.ne.s32.totalorder %s20_s26, %s1636_s29  ;;  %p1642_p7 = scmp.lt.s32.totalorder %s1636_s29, %s1636_s29 }
  0x13   :  { %p1643_p8 = por %p1642_p7, %p1641_p6 }
  0x15   :  { %p1644_p9 = pnand %p1643_p8, %p1637_p5 }
  0x17   :  { %1647 = shalt.err (!%p1644_p9)
}
  0x18   :  { %22 = dma.hbm_to_vmem [thread:$0]  %s1750_s0, 1024, %s20_s26, [#allocation3]  }
  0x19   :  { %s1656_s7 = scalar_lea.vmem %s43_s28, 2048  ;;  %p1661_p11 = scmp.lt.s32.totalorder %s43_s28, %s43_s28 }
  0x1a   :  { %p1657_p10 = scmp.ne.s32.totalorder %s43_s28, %s1656_s7  ;;  %p1662_p12 = scmp.lt.s32.totalorder %s1656_s7, %s1656_s7 }
  0x1c   :  { %p1663_p13 = por %p1662_p12, %p1661_p11 }
  0x1e   :  { %p1664_p0 = pnand %p1663_p13, %p1657_p10 }
  0x20   :  { %1667 = shalt.err (!%p1664_p0)
}
  0x21   :  { %s1699_s1 = smov 64   ;;  %s1700_s8 = smov 4  }
  0x22   :  { %48 = dma.hbm_to_vmem [thread:$0]  %s1753_s3, 2048, %s43_s28, [#allocation6], %s1699_s1, %s1699_s1, %s1700_s8  }
  0x23   :  { %1688 = dma.done.wait [#allocation3], 1024  }
  0x24   :  { %1689 = vsyncadd [#allocation3], 4294966272 }
  0x25   :  { %1690 = dma.done.wait [#allocation6], 18432  }
  0x26   :  { %1691 = vsyncadd [#allocation6], 4294948864  ;;  %v1400_v0 = vld [vmem:[#allocation5 + $0x74] ss:$8 sps:$4 sm:$0xff]   ;;  %v1404_v2 = vld [vmem:[#allocation5 + $0x70] ss:$8 sps:$4 sm:$0xff]  }
  0x27   :  { %v1402_v1 = vld [vmem:[#allocation5 + $0x174] ss:$8 sps:$4 sm:$0xff]   ;;  %865 = vmatprep.subr.bf16.mxu0 %v1400_v0  ;;  %v1405_v3 = vld [vmem:[#allocation5 + $0x170] ss:$8 sps:$4 sm:$0xff]   ;;  %v1406_v4 = vld [vmem:[#allocation5 + $0x64] ss:$8 sps:$4 sm:$0xff]  }
  0x28   :  { %906 = vmatprep.subr.bf16.mxu1 %v1402_v1  ;;  %866 = vmatpush1.bf16.msra.mxu0 %v1404_v2  ;;  %v1408_v5 = vld [vmem:[#allocation5 + $0x164] ss:$8 sps:$4 sm:$0xff]   ;;  %v1410_v6 = vld [vmem:[#allocation5 + $0x60] ss:$8 sps:$4 sm:$0xff]   ;;  %v1412_v8 = vld [vmem:[#allocation5 + $0x54] ss:$8 sps:$4 sm:$0xff]  }
  0x29   :  { %907 = vmatpush1.bf16.msra.mxu1 %v1405_v3  ;;  %867 = vmatprep.subr.bf16.mxu0 %v1406_v4  ;;  %v1411_v7 = vld [vmem:[#allocation5 + $0x160] ss:$8 sps:$4 sm:$0xff]   ;;  %v1414_v9 = vld [vmem:[#allocation5 + $0x154] ss:$8 sps:$4 sm:$0xff]   ;;  %v1416_v10 = vld [vmem:[#allocation5 + $0x50] ss:$8 sps:$4 sm:$0xff]  }
  0x2a   :  { %908 = vmatprep.subr.bf16.mxu1 %v1408_v5  ;;  %v1417_v11 = vld [vmem:[#allocation5 + $0x150] ss:$8 sps:$4 sm:$0xff]   ;;  %v1418_v12 = vld [vmem:[#allocation5 + $0x44] ss:$8 sps:$4 sm:$0xff]   ;;  %v1422_v14 = vld [vmem:[#allocation5 + $0x40] ss:$8 sps:$4 sm:$0xff]  }
  0x2b   :  { %v1420_v13 = vld [vmem:[#allocation5 + $0x144] ss:$8 sps:$4 sm:$0xff]   ;;  %v1423_v15 = vld [vmem:[#allocation5 + $0x140] ss:$8 sps:$4 sm:$0xff]   ;;  %v1424_v16 = vld [vmem:[#allocation5 + $0x34] ss:$8 sps:$4 sm:$0xff]  }
  0x2c   :  { %868 = vmatpush1.bf16.msra.mxu0 %v1410_v6  ;;  %v1426_v17 = vld [vmem:[#allocation5 + $0x134] ss:$8 sps:$4 sm:$0xff]   ;;  %v1428_v18 = vld [vmem:[#allocation5 + $0x30] ss:$8 sps:$4 sm:$0xff]   ;;  %v1430_v20 = vld [vmem:[#allocation5 + $0x24] ss:$8 sps:$4 sm:$0xff]  }
  0x2d   :  { %909 = vmatpush1.bf16.msra.mxu1 %v1411_v7  ;;  %869 = vmatprep.subr.bf16.mxu0 %v1412_v8  ;;  %v1429_v19 = vld [vmem:[#allocation5 + $0x130] ss:$8 sps:$4 sm:$0xff]   ;;  %v1432_v21 = vld [vmem:[#allocation5 + $0x124] ss:$8 sps:$4 sm:$0xff]   ;;  %v1434_v22 = vld [vmem:[#allocation5 + $0x20] ss:$8 sps:$4 sm:$0xff]  }
  0x2e   :  { %910 = vmatprep.subr.bf16.mxu1 %v1414_v9  ;;  %v1435_v23 = vld [vmem:[#allocation5 + $0x120] ss:$8 sps:$4 sm:$0xff]   ;;  %v1436_v24 = vld [vmem:[#allocation5 + $0x14] ss:$8 sps:$4 sm:$0xff]   ;;  %v1440_v26 = vld [vmem:[#allocation5 + $0x10] ss:$8 sps:$4 sm:$0xff]  }
  0x2f   :  { %v1438_v25 = vld [vmem:[#allocation5 + $0x114] ss:$8 sps:$4 sm:$0xff]   ;;  %v1441_v27 = vld [vmem:[#allocation5 + $0x110] ss:$8 sps:$4 sm:$0xff]   ;;  %v1442_v28 = vld [vmem:[#allocation5 + $0x4] ss:$8 sps:$4 sm:$0xff]  }
  0x30   :  { %870 = vmatpush1.bf16.msra.mxu0 %v1416_v10  ;;  %v1444_v29 = vld [vmem:[#allocation5 + $0x104] ss:$8 sps:$4 sm:$0xff]   ;;  %v1446_v30 = vld [vmem:[#allocation5] ss:$8 sps:$4 sm:$0xff]   ;;  %v1448_v32 = vld [vmem:[#allocation5 + $0xf4] ss:$8 sps:$4 sm:$0xff]  }
  0x31   :  { %911 = vmatpush1.bf16.msra.mxu1 %v1417_v11  ;;  %871 = vmatprep.subr.bf16.mxu0 %v1418_v12  ;;  %v1447_v31 = vld [vmem:[#allocation5 + $0x100] ss:$8 sps:$4 sm:$0xff]   ;;  %v1450_v33 = vld [vmem:[#allocation5 + $0x1f4] ss:$8 sps:$4 sm:$0xff]   ;;  %v1452_v34 = vld [vmem:[#allocation5 + $0xf0] ss:$8 sps:$4 sm:$0xff]  }
  0x32   :  { %912 = vmatprep.subr.bf16.mxu1 %v1420_v13  ;;  %v1453_v35 = vld [vmem:[#allocation5 + $0x1f0] ss:$8 sps:$4 sm:$0xff]   ;;  %v1454_v36 = vld [vmem:[#allocation5 + $0xe4] ss:$8 sps:$4 sm:$0xff]   ;;  %v1458_v38 = vld [vmem:[#allocation5 + $0xe0] ss:$8 sps:$4 sm:$0xff]  }
  0x33   :  { %v1456_v37 = vld [vmem:[#allocation5 + $0x1e4] ss:$8 sps:$4 sm:$0xff]   ;;  %v1459_v39 = vld [vmem:[#allocation5 + $0x1e0] ss:$8 sps:$4 sm:$0xff]   ;;  %v1460_v40 = vld [vmem:[#allocation5 + $0xd4] ss:$8 sps:$4 sm:$0xff]  }
  0x34   :  { %872 = vmatpush1.bf16.msra.mxu0 %v1422_v14  ;;  %v1462_v41 = vld [vmem:[#allocation5 + $0x1d4] ss:$8 sps:$4 sm:$0xff]   ;;  %v1464_v42 = vld [vmem:[#allocation5 + $0xd0] ss:$8 sps:$4 sm:$0xff]   ;;  %v1466_v44 = vld [vmem:[#allocation5 + $0xc4] ss:$8 sps:$4 sm:$0xff]  }
  0x35   :  { %913 = vmatpush1.bf16.msra.mxu1 %v1423_v15  ;;  %873 = vmatprep.subr.bf16.mxu0 %v1424_v16  ;;  %v1465_v43 = vld [vmem:[#allocation5 + $0x1d0] ss:$8 sps:$4 sm:$0xff]   ;;  %v1468_v45 = vld [vmem:[#allocation5 + $0x1c4] ss:$8 sps:$4 sm:$0xff]   ;;  %v1470_v47 = vld [vmem:[#allocation5 + $0xc0] ss:$8 sps:$4 sm:$0xff]  }
  0x36   :  { %914 = vmatprep.subr.bf16.mxu1 %v1426_v17  ;;  %v62_v46 = vld [vmem:[#allocation2 + $0x8] sm:$0xff]  ;;  %v64_v50 = vld [vmem:[#allocation2 + $0x18] sm:$0xff]  ;;  %v61_v3 = vld [vmem:[#allocation2] sm:$0xff]  ;;  %s1701_s12 = smov [#allocation8]  }
  0x37   :  { %v1471_v48 = vld [vmem:[#allocation5 + $0x1c0] ss:$8 sps:$4 sm:$0xff]   ;;  %v70_v49 = vmax.f32 %v62_v46, 0.0  ;;  %v72_v51 = vmax.f32 %v64_v50, 0.0  ;;  %v1472_v52 = vld [vmem:[#allocation5 + $0xb4] ss:$8 sps:$4 sm:$0xff]  }
  0x38   :  { %874 = vmatpush1.bf16.msra.mxu0 %v1428_v18  ;;  %v1474_v53 = vld [vmem:[#allocation5 + $0x1b4] ss:$8 sps:$4 sm:$0xff]   ;;  %v1476_v56 = vld [vmem:[#allocation5 + $0xb0] ss:$8 sps:$4 sm:$0xff]   ;;  %v1478_v58 = vld [vmem:[#allocation5 + $0xa4] ss:$8 sps:$4 sm:$0xff]  }
  0x39   :  { %915 = vmatpush1.bf16.msra.mxu1 %v1429_v19  ;;  %875 = vmatprep.subr.bf16.mxu0 %v1430_v20  ;;  %v78_v54 = vpack.c.bf16 %v70_v49, %v70_v49  ;;  %v80_v55 = vpack.c.bf16 %v72_v51, %v72_v51  ;;  %v1477_v57 = vld [vmem:[#allocation5 + $0x1b0] ss:$8 sps:$4 sm:$0xff]   ;;  %v1480_v59 = vld [vmem:[#allocation5 + $0x1a4] ss:$8 sps:$4 sm:$0xff]   ;;  %v1482_v60 = vld [vmem:[#allocation5 + $0xa0] ss:$8 sps:$4 sm:$0xff]  }
  0x3a   :  { %916 = vmatprep.subr.bf16.mxu1 %v1432_v21  ;;  %v1483_v61 = vld [vmem:[#allocation5 + $0x1a0] ss:$8 sps:$4 sm:$0xff]   ;;  %v1484_v62 = vld [vmem:[#allocation5 + $0x94] ss:$8 sps:$4 sm:$0xff]   ;;  %v1488_v0 = vld [vmem:[#allocation5 + $0x90] ss:$8 sps:$4 sm:$0xff]  }
  0x3b   :  { %897 = vmatprep.mubr.bf16.mxu0 %v78_v54  ;;  %938 = vmatprep.mubr.bf16.mxu1 %v80_v55  ;;  %v1486_v63 = vld [vmem:[#allocation5 + $0x194] ss:$8 sps:$4 sm:$0xff]   ;;  %v1489_v1 = vld [vmem:[#allocation5 + $0x190] ss:$8 sps:$4 sm:$0xff]   ;;  %v1490_v2 = vld [vmem:[#allocation5 + $0x84] ss:$8 sps:$4 sm:$0xff]  }
  0x3c   :  { %876 = vmatpush1.bf16.msra.mxu0 %v1434_v22  ;;  %v63_v4 = vld [vmem:[#allocation2 + $0x10] sm:$0xff]  ;;  %v1492_v5 = vld [vmem:[#allocation5 + $0x184] ss:$8 sps:$4 sm:$0xff]   ;;  %v1494_v6 = vld [vmem:[#allocation5 + $0x80] ss:$8 sps:$4 sm:$0xff]   ;;  %v69_v8 = vmax.f32 %v61_v3, 0.0 }
  0x3d   :  { %917 = vmatpush1.bf16.msra.mxu1 %v1435_v23  ;;  %877 = vmatprep.subr.bf16.mxu0 %v1436_v24  ;;  %v1495_v7 = vld [vmem:[#allocation5 + $0x180] ss:$8 sps:$4 sm:$0xff]   ;;  %v71_v9 = vmax.f32 %v63_v4, 0.0  ;;  %v1498_v10 = vld [vmem:[#allocation5 + $0x274] ss:$8 sps:$4 sm:$0xff]   ;;  %s1215_s13 = sshll.u32 %s1701_s12, 4  ;;  %s1216_s13 = int_to_ptr.vmem [resolvable:$true] %s1215_s13 }
  0x3e   :  { %918 = vmatprep.subr.bf16.mxu1 %v1438_v25  ;;  %v1501_v11 = vld [vmem:[#allocation5 + $0x374] ss:$8 sps:$4 sm:$0xff]   ;;  %v77_v12 = vpack.c.bf16 %v69_v8, %v69_v8  ;;  %v1496_v14 = vld [vmem:[#allocation5 + $0x270] ss:$8 sps:$4 sm:$0xff]   ;;  %v1504_v16 = vld [vmem:[#allocation5 + $0x264] ss:$8 sps:$4 sm:$0xff]   ;;  %p1673_p2 = scmp.lt.s32.totalorder %s1216_s13, %s1216_s13 }
  0x3f   :  { %v79_v13 = vpack.c.bf16 %v71_v9, %v71_v9  ;;  %v1499_v15 = vld [vmem:[#allocation5 + $0x370] ss:$8 sps:$4 sm:$0xff]   ;;  %v1507_v17 = vld [vmem:[#allocation5 + $0x364] ss:$8 sps:$4 sm:$0xff]   ;;  %v1502_v18 = vld [vmem:[#allocation5 + $0x260] ss:$8 sps:$4 sm:$0xff]  }
  0x40   :  { %878 = vmatpush1.bf16.msra.mxu0 %v1440_v26  ;;  %v1505_v19 = vld [vmem:[#allocation5 + $0x360] ss:$8 sps:$4 sm:$0xff]   ;;  %v1510_v20 = vld [vmem:[#allocation5 + $0x254] ss:$8 sps:$4 sm:$0xff]   ;;  %v1508_v22 = vld [vmem:[#allocation5 + $0x250] ss:$8 sps:$4 sm:$0xff]  }
  0x41   :  { %919 = vmatpush1.bf16.msra.mxu1 %v1441_v27  ;;  %879 = vmatprep.subr.bf16.mxu0 %v1442_v28  ;;  %v1513_v21 = vld [vmem:[#allocation5 + $0x354] ss:$8 sps:$4 sm:$0xff]   ;;  %v1511_v23 = vld [vmem:[#allocation5 + $0x350] ss:$8 sps:$4 sm:$0xff]   ;;  %v1516_v24 = vld [vmem:[#allocation5 + $0x244] ss:$8 sps:$4 sm:$0xff]  }
  0x42   :  { %920 = vmatprep.subr.bf16.mxu1 %v1444_v29  ;;  %v1519_v25 = vld [vmem:[#allocation5 + $0x344] ss:$8 sps:$4 sm:$0xff]   ;;  %v1514_v26 = vld [vmem:[#allocation5 + $0x240] ss:$8 sps:$4 sm:$0xff]   ;;  %v1522_v28 = vld [vmem:[#allocation5 + $0x234] ss:$8 sps:$4 sm:$0xff]  }
  0x43   :  { %v1517_v27 = vld [vmem:[#allocation5 + $0x340] ss:$8 sps:$4 sm:$0xff]   ;;  %v1525_v29 = vld [vmem:[#allocation5 + $0x334] ss:$8 sps:$4 sm:$0xff]   ;;  %v1552_v54 = vld [vmem:[#allocation5 + $0x2e4] ss:$8 sps:$4 sm:$0xff]  }
  0x44   :  { %880 = vmatpush1.bf16.msra.mxu0 %v1446_v30  ;;  %v1520_v30 = vld [vmem:[#allocation5 + $0x230] ss:$8 sps:$4 sm:$0xff]   ;;  %v1546_v50 = vld [vmem:[#allocation5 + $0x2f4] ss:$8 sps:$4 sm:$0xff]   ;;  %v1555_v55 = vld [vmem:[#allocation5 + $0x3e4] ss:$8 sps:$4 sm:$0xff]  }
  0x45   :  { %921 = vmatpush1.bf16.msra.mxu1 %v1447_v31  ;;  %881 = vmatprep.subr.bf16.mxu0 %v1448_v32  ;;  %v1523_v31 = vld [vmem:[#allocation5 + $0x330] ss:$8 sps:$4 sm:$0xff]   ;;  %v1528_v32 = vld [vmem:[#allocation5 + $0x224] ss:$8 sps:$4 sm:$0xff]   ;;  %v1549_v51 = vld [vmem:[#allocation5 + $0x3f4] ss:$8 sps:$4 sm:$0xff]  }
  0x46   :  { %922 = vmatprep.subr.bf16.mxu1 %v1450_v33  ;;  %v1531_v33 = vld [vmem:[#allocation5 + $0x324] ss:$8 sps:$4 sm:$0xff]   ;;  %v1573_v3 = vld [vmem:[#allocation5 + $0x3b4] ss:$8 sps:$4 sm:$0xff]   ;;  %v1568_v4 = vld [vmem:[#allocation5 + $0x2b0] ss:$8 sps:$4 sm:$0xff]  }
  0x47   :  { %v1574_v8 = vld [vmem:[#allocation5 + $0x2a0] ss:$8 sps:$4 sm:$0xff]   ;;  %s1668_s14 = scalar_lea.vmem %s1216_s13, 128 }
  0x48   :  { %882 = vmatpush2.bf16.msra.mxu0 %v1452_v34  ;;  %v1526_v34 = vld [vmem:[#allocation5 + $0x220] ss:$8 sps:$4 sm:$0xff]   ;;  %p1669_p1 = scmp.ne.s32.totalorder %s1216_s13, %s1668_s14  ;;  %p1674_p3 = scmp.lt.s32.totalorder %s1668_s14, %s1668_s14 }
  0x49   :  { %923 = vmatpush2.bf16.msra.mxu1 %v1453_v35  ;;  %883 = vmatprep.subr.bf16.mxu0 %v1454_v36  ;;  %v1529_v35 = vld [vmem:[#allocation5 + $0x320] ss:$8 sps:$4 sm:$0xff]   ;;  %v1534_v36 = vld [vmem:[#allocation5 + $0x214] ss:$8 sps:$4 sm:$0xff]  }
  0x4a   :  { %924 = vmatprep.subr.bf16.mxu1 %v1456_v37  ;;  %v1537_v37 = vld [vmem:[#allocation5 + $0x314] ss:$8 sps:$4 sm:$0xff]   ;;  %v1577_v9 = vld [vmem:[#allocation5 + $0x3a0] ss:$8 sps:$4 sm:$0xff]   ;;  %p1675_p4 = por %p1674_p3, %p1673_p2 }
  0x4c   :  { %884 = vmatpush2.bf16.msra.mxu0 %v1458_v38  ;;  %v66_v38 = vld [vmem:[#allocation2 + $0x28] sm:$0xff]  ;;  %p1676_p5 = pnand %p1675_p4, %p1669_p1 }
  0x4d   :  { %925 = vmatpush2.bf16.msra.mxu1 %v1459_v39  ;;  %885 = vmatprep.subr.bf16.mxu0 %v1460_v40  ;;  %v1532_v39 = vld [vmem:[#allocation5 + $0x210] ss:$8 sps:$4 sm:$0xff]  }
  0x4e   :  { %926 = vmatprep.subr.bf16.mxu1 %v1462_v41  ;;  %v1535_v40 = vld [vmem:[#allocation5 + $0x310] ss:$8 sps:$4 sm:$0xff]   ;;  %v74_v41 = vmax.f32 %v66_v38, 0.0  ;;  %v1606_v38 = vld [vmem:[#allocation7 + $0x40] sm:$0xff]  }
  0x50   :  { %886 = vmatpush2.bf16.msra.mxu0 %v1464_v42  ;;  %v68_v42 = vld [vmem:[#allocation2 + $0x38] sm:$0xff]  ;;  %v82_v46 = vpack.c.bf16 %v74_v41, %v74_v41 }
  0x51   :  { %927 = vmatpush2.bf16.msra.mxu1 %v1465_v43  ;;  %887 = vmatprep.subr.bf16.mxu0 %v1466_v44  ;;  %v1540_v43 = vld [vmem:[#allocation5 + $0x204] ss:$8 sps:$4 sm:$0xff]  }
  0x52   :  { %928 = vmatprep.subr.bf16.mxu1 %v1468_v45  ;;  %v1543_v44 = vld [vmem:[#allocation5 + $0x304] ss:$8 sps:$4 sm:$0xff]   ;;  %v76_v45 = vmax.f32 %v68_v42, 0.0 }
  0x54   :  { %888 = vmatpush2.bf16.msra.mxu0 %v1470_v47  ;;  %v1538_v47 = vld [vmem:[#allocation5 + $0x200] ss:$8 sps:$4 sm:$0xff]   ;;  %v84_v49 = vpack.c.bf16 %v76_v45, %v76_v45 }
  0x55   :  { %929 = vmatpush2.bf16.msra.mxu1 %v1471_v48  ;;  %889 = vmatprep.subr.bf16.mxu0 %v1472_v52  ;;  %v1541_v48 = vld [vmem:[#allocation5 + $0x300] ss:$8 sps:$4 sm:$0xff]   ;;  %v1544_v52 = vld [vmem:[#allocation5 + $0x2f0] ss:$8 sps:$4 sm:$0xff]  }
  0x56   :  { %930 = vmatprep.subr.bf16.mxu1 %v1474_v53  ;;  %v1547_v53 = vld [vmem:[#allocation5 + $0x3f0] ss:$8 sps:$4 sm:$0xff]  }
  0x58   :  { %890 = vmatpush2.bf16.msra.mxu0 %v1476_v56  ;;  %v1550_v56 = vld [vmem:[#allocation5 + $0x2e0] ss:$8 sps:$4 sm:$0xff]  }
  0x59   :  { %931 = vmatpush2.bf16.msra.mxu1 %v1477_v57  ;;  %891 = vmatprep.subr.bf16.mxu0 %v1478_v58  ;;  %v1553_v57 = vld [vmem:[#allocation5 + $0x3e0] ss:$8 sps:$4 sm:$0xff]   ;;  %v1558_v58 = vld [vmem:[#allocation5 + $0x2d4] ss:$8 sps:$4 sm:$0xff]  }
  0x5a   :  { %932 = vmatprep.subr.bf16.mxu1 %v1480_v59  ;;  %v1561_v59 = vld [vmem:[#allocation5 + $0x3d4] ss:$8 sps:$4 sm:$0xff]  }
  0x5c   :  { %892 = vmatpush2.bf16.msra.mxu0 %v1482_v60  ;;  %v1556_v60 = vld [vmem:[#allocation5 + $0x2d0] ss:$8 sps:$4 sm:$0xff]  }
  0x5d   :  { %933 = vmatpush2.bf16.msra.mxu1 %v1483_v61  ;;  %893 = vmatprep.subr.bf16.mxu0 %v1484_v62  ;;  %v1559_v61 = vld [vmem:[#allocation5 + $0x3d0] ss:$8 sps:$4 sm:$0xff]   ;;  %v1564_v62 = vld [vmem:[#allocation5 + $0x2c4] ss:$8 sps:$4 sm:$0xff]  }
  0x5e   :  { %934 = vmatprep.subr.bf16.mxu1 %v1486_v63  ;;  %v1567_v63 = vld [vmem:[#allocation5 + $0x3c4] ss:$8 sps:$4 sm:$0xff]  }
  0x60   :  { %894 = vmatpush2.bf16.msra.mxu0 %v1488_v0  ;;  %v1562_v0 = vld [vmem:[#allocation5 + $0x2c0] ss:$8 sps:$4 sm:$0xff]  }
  0x61   :  { %935 = vmatpush2.bf16.msra.mxu1 %v1489_v1  ;;  %895 = vmatprep.subr.bf16.mxu0 %v1490_v2  ;;  %v1565_v1 = vld [vmem:[#allocation5 + $0x3c0] ss:$8 sps:$4 sm:$0xff]   ;;  %v1570_v2 = vld [vmem:[#allocation5 + $0x2b4] ss:$8 sps:$4 sm:$0xff]  }
  0x62   :  { %936 = vmatprep.subr.bf16.mxu1 %v1492_v5  ;;  %v1571_v5 = vld [vmem:[#allocation5 + $0x3b0] ss:$8 sps:$4 sm:$0xff]  }
  0x64   :  { %896 = vmatpush2.bf16.msra.mxu0 %v1494_v6  ;;  %v1576_v6 = vld [vmem:[#allocation5 + $0x2a4] ss:$8 sps:$4 sm:$0xff]  }
  0x65   :  { %937 = vmatpush2.bf16.msra.mxu1 %v1495_v7  ;;  %947 = vmatprep.subr.bf16.mxu0 %v1498_v10  ;;  %v1579_v7 = vld [vmem:[#allocation5 + $0x3a4] ss:$8 sps:$4 sm:$0xff]   ;;  %v1582_v10 = vld [vmem:[#allocation5 + $0x294] ss:$8 sps:$4 sm:$0xff]  }
  0x66   :  { %988 = vmatprep.subr.bf16.mxu1 %v1501_v11  ;;  %v1585_v11 = vld [vmem:[#allocation5 + $0x394] ss:$8 sps:$4 sm:$0xff]  }
  0x67   :  { %898 = vmatmul.mubr.bf16.vlgmr.msra.gmra.mxu0 %v77_v12  ;;  %v1580_v12 = vld [vmem:[#allocation5 + $0x290] ss:$8 sps:$4 sm:$0xff]  }
  0x68   :  { %939 = vmatmul.mubr.bf16.vlgmr.msra.gmra.mxu1 %v79_v13  ;;  %948 = vmatpush1.bf16.msra.mxu0 %v1496_v14  ;;  %v1583_v13 = vld [vmem:[#allocation5 + $0x390] ss:$8 sps:$4 sm:$0xff]   ;;  %v65_v14 = vld [vmem:[#allocation2 + $0x20] sm:$0xff] }
  0x69   :  { %989 = vmatpush1.bf16.msra.mxu1 %v1499_v15  ;;  %949 = vmatprep.subr.bf16.mxu0 %v1504_v16  ;;  %v67_v15 = vld [vmem:[#allocation2 + $0x30] sm:$0xff]  ;;  %v1588_v16 = vld [vmem:[#allocation5 + $0x284] ss:$8 sps:$4 sm:$0xff]  }
  0x6a   :  { %990 = vmatprep.subr.bf16.mxu1 %v1507_v17  ;;  %979 = vmatprep.mubr.bf16.mxu0 %v82_v46  ;;  %v1591_v17 = vld [vmem:[#allocation5 + $0x384] ss:$8 sps:$4 sm:$0xff]  }
  0x6b   :  { %1020 = vmatprep.mubr.bf16.mxu1 %v84_v49 }
  0x6c   :  { %950 = vmatpush1.bf16.msra.mxu0 %v1502_v18  ;;  %v73_v18 = vmax.f32 %v65_v14, 0.0 }
  0x6d   :  { %991 = vmatpush1.bf16.msra.mxu1 %v1505_v19  ;;  %951 = vmatprep.subr.bf16.mxu0 %v1510_v20  ;;  %v75_v19 = vmax.f32 %v67_v15, 0.0  ;;  %v1586_v20 = vld [vmem:[#allocation5 + $0x280] ss:$8 sps:$4 sm:$0xff]  }
  0x6e   :  { %992 = vmatprep.subr.bf16.mxu1 %v1513_v21  ;;  %v1589_v21 = vld [vmem:[#allocation5 + $0x380] ss:$8 sps:$4 sm:$0xff]  }
  0x70   :  { %952 = vmatpush1.bf16.msra.mxu0 %v1508_v22  ;;  %v81_v22 = vpack.c.bf16 %v73_v18, %v73_v18 }
  0x71   :  { %993 = vmatpush1.bf16.msra.mxu1 %v1511_v23  ;;  %953 = vmatprep.subr.bf16.mxu0 %v1516_v24  ;;  %v83_v23 = vpack.c.bf16 %v75_v19, %v75_v19  ;;  %v1592_v24 = vld [vmem:[#allocation7 + $0x78] sm:$0xff]  }
  0x72   :  { %994 = vmatprep.subr.bf16.mxu1 %v1519_v25  ;;  %v1593_v25 = vld [vmem:[#allocation7 + $0x38] sm:$0xff]  }
  0x74   :  { %954 = vmatpush1.bf16.msra.mxu0 %v1514_v26  ;;  %v1594_v26 = vld [vmem:[#allocation7 + $0x70] sm:$0xff]  }
  0x75   :  { %995 = vmatpush1.bf16.msra.mxu1 %v1517_v27  ;;  %955 = vmatprep.subr.bf16.mxu0 %v1522_v28  ;;  %v1595_v27 = vld [vmem:[#allocation7 + $0x30] sm:$0xff]   ;;  %v1596_v28 = vld [vmem:[#allocation7 + $0x68] sm:$0xff]  }
  0x76   :  { %996 = vmatprep.subr.bf16.mxu1 %v1525_v29  ;;  %v1597_v29 = vld [vmem:[#allocation7 + $0x28] sm:$0xff]  }
  0x78   :  { %956 = vmatpush1.bf16.msra.mxu0 %v1520_v30  ;;  %v1598_v30 = vld [vmem:[#allocation7 + $0x60] sm:$0xff]  }
  0x79   :  { %997 = vmatpush1.bf16.msra.mxu1 %v1523_v31  ;;  %957 = vmatprep.subr.bf16.mxu0 %v1528_v32  ;;  %v1599_v31 = vld [vmem:[#allocation7 + $0x20] sm:$0xff]   ;;  %v1600_v32 = vld [vmem:[#allocation7 + $0x58] sm:$0xff]  }
  0x7a   :  { %998 = vmatprep.subr.bf16.mxu1 %v1531_v33  ;;  %v1601_v33 = vld [vmem:[#allocation7 + $0x18] sm:$0xff]  }
  0x7c   :  { %958 = vmatpush1.bf16.msra.mxu0 %v1526_v34  ;;  %v1602_v34 = vld [vmem:[#allocation7 + $0x50] sm:$0xff]  }
  0x7d   :  { %999 = vmatpush1.bf16.msra.mxu1 %v1529_v35  ;;  %959 = vmatprep.subr.bf16.mxu0 %v1534_v36  ;;  %v1603_v35 = vld [vmem:[#allocation7 + $0x10] sm:$0xff]   ;;  %v1604_v36 = vld [vmem:[#allocation7 + $0x48] sm:$0xff]  }
  0x7e   :  { %1000 = vmatprep.subr.bf16.mxu1 %v1537_v37  ;;  %v1605_v37 = vld [vmem:[#allocation7 + $0x8] sm:$0xff]  }
  0x80   :  { %960 = vmatpush1.bf16.msra.mxu0 %v1532_v39  ;;  %v1607_v39 = vld [vmem:[#allocation7] sm:$0xff]  }
  0x81   :  { %1001 = vmatpush1.bf16.msra.mxu1 %v1535_v40  ;;  %961 = vmatprep.subr.bf16.mxu0 %v1540_v43 }
  0x82   :  { %1002 = vmatprep.subr.bf16.mxu1 %v1543_v44 }
  0x84   :  { %962 = vmatpush1.bf16.msra.mxu0 %v1538_v47 }
  0x85   :  { %1003 = vmatpush1.bf16.msra.mxu1 %v1541_v48  ;;  %963 = vmatprep.subr.bf16.mxu0 %v1546_v50  ;;  %v215_v48 = vlaneseq }
  0x86   :  { %1004 = vmatprep.subr.bf16.mxu1 %v1549_v51  ;;  %v213_v51 = vld [vmem:[%s1752_s2] sm:$0x3] }
  0x87   :  { %v216_v49 = vshrl.u32 %v215_v48, 7 }
  0x88   :  { %964 = vmatpush2.bf16.msra.mxu0 %v1544_v52 }
  0x89   :  { %1005 = vmatpush2.bf16.msra.mxu1 %v1547_v53  ;;  %965 = vmatprep.subr.bf16.mxu0 %v1552_v54  ;;  %v217_v50 = vsub.s32 0, %v216_v49  ;;  %v221_v52 = vsub.s32 1, %v216_v49 }
  0x8a   :  { %1006 = vmatprep.subr.bf16.mxu1 %v1555_v55 }
  0x8b   :  { %v218_v53 = vrot.slane %v213_v51, %v217_v50  ;;  %v222_v54 = vrot.slane %v213_v51, %v221_v52 }
  0x8c   :  { %966 = vmatpush2.bf16.msra.mxu0 %v1550_v56 }
  0x8d   :  { %1007 = vmatpush2.bf16.msra.mxu1 %v1553_v57  ;;  %967 = vmatprep.subr.bf16.mxu0 %v1558_v58 }
  0x8e   :  { %1008 = vmatprep.subr.bf16.mxu1 %v1561_v59 }
  0x90   :  { %968 = vmatpush2.bf16.msra.mxu0 %v1556_v60 }
  0x91   :  { %1009 = vmatpush2.bf16.msra.mxu1 %v1559_v61  ;;  %969 = vmatprep.subr.bf16.mxu0 %v1564_v62 }
  0x92   :  { %1010 = vmatprep.subr.bf16.mxu1 %v1567_v63 }
  0x94   :  { %970 = vmatpush2.bf16.msra.mxu0 %v1562_v0 }
  0x95   :  { %1011 = vmatpush2.bf16.msra.mxu1 %v1565_v1  ;;  %971 = vmatprep.subr.bf16.mxu0 %v1570_v2 }
  0x96   :  { %1012 = vmatprep.subr.bf16.mxu1 %v1573_v3 }
  0x98   :  { %972 = vmatpush2.bf16.msra.mxu0 %v1568_v4 }
  0x99   :  { %1013 = vmatpush2.bf16.msra.mxu1 %v1571_v5  ;;  %973 = vmatprep.subr.bf16.mxu0 %v1576_v6 }
  0x9a   :  { %1014 = vmatprep.subr.bf16.mxu1 %v1579_v7 }
  0x9c   :  { %974 = vmatpush2.bf16.msra.mxu0 %v1574_v8 }
  0x9d   :  { %1015 = vmatpush2.bf16.msra.mxu1 %v1577_v9  ;;  %975 = vmatprep.subr.bf16.mxu0 %v1582_v10 }
  0x9e   :  { %1016 = vmatprep.subr.bf16.mxu1 %v1585_v11 }
  0xa0   :  { %976 = vmatpush2.bf16.msra.mxu0 %v1580_v12  ;;  %v1353_v12 = vld [vmem:[%s1754_s4] ss:$0 sm:$0xff] }
  0xa1   :  { %1017 = vmatpush2.bf16.msra.mxu1 %v1583_v13  ;;  %977 = vmatprep.subr.bf16.mxu0 %v1588_v16 }
  0xa2   :  { %1018 = vmatprep.subr.bf16.mxu1 %v1591_v17 }
  0xa4   :  { %978 = vmatpush2.bf16.msra.mxu0 %v1586_v20 }
  0xa5   :  { %1019 = vmatpush2.bf16.msra.mxu1 %v1589_v21  ;;  %1370 = vmatprep.subr.bf16.mxu0 %v1592_v24 }
  0xa7   :  { %980 = vmatmul.mubr.bf16.vlgmr.msra.gmra.mxu0 %v81_v22 }
  0xa8   :  { %1021 = vmatmul.mubr.bf16.vlgmr.msra.gmra.mxu1 %v83_v23  ;;  %1371 = vmatpush3.bf16.msra.mxu0 %v1593_v25 }
  0xa9   :  { %1372 = vmatprep.subr.bf16.mxu0 %v1594_v26 }
  0xac   :  { %1373 = vmatpush3.bf16.msra.mxu0 %v1595_v27 }
  0xad   :  { %1374 = vmatprep.subr.bf16.mxu0 %v1596_v28 }
  0xb0   :  { %1375 = vmatpush3.bf16.msra.mxu0 %v1597_v29 }
  0xb1   :  { %1376 = vmatprep.subr.bf16.mxu0 %v1598_v30 }
  0xb4   :  { %1377 = vmatpush3.bf16.msra.mxu0 %v1599_v31 }
  0xb5   :  { %1378 = vmatprep.subr.bf16.mxu0 %v1600_v32 }
  0xb8   :  { %1379 = vmatpush3.bf16.msra.mxu0 %v1601_v33 }
  0xb9   :  { %1380 = vmatprep.subr.bf16.mxu0 %v1602_v34 }
  0xbc   :  { %1381 = vmatpush3.bf16.msra.mxu0 %v1603_v35 }
  0xbd   :  { %1382 = vmatprep.subr.bf16.mxu0 %v1604_v36 }
  0xc0   :  { %1383 = vmatpush3.bf16.msra.mxu0 %v1605_v37 }
  0xc1   :  { %1384 = vmatprep.subr.bf16.mxu0 %v1606_v38 }
  0xc4   :  { %1385 = vmatpush3.bf16.msra.mxu0 %v1607_v39 }
 0x127   :  { %v899_v40 = vpop.f32.mrf.mxu0 }
 0x128   :  { %v940_v41 = vpop.f32.mrf.mxu1  ;;  %v900_v55 = vadd.f32 %v899_v40, %v218_v53 }
 0x129   :  { %v901_v42 = vpop.f32.mrf.mxu0 }
 0x12a   :  { %v942_v43 = vpop.f32.mrf.mxu1  ;;  %v902_v56 = vadd.f32 %v901_v42, %v222_v54  ;;  %v941_v57 = vadd.f32 %v940_v41, %v900_v55 }
 0x12b   :  { %v903_v44 = vpop.f32.mrf.mxu0 }
 0x12c   :  { %v944_v45 = vpop.f32.mrf.mxu1  ;;  %v943_v60 = vadd.f32 %v942_v43, %v902_v56 }
 0x12d   :  { %v904_v46 = vpop.f32.mrf.mxu0 }
 0x12e   :  { %v945_v47 = vpop.f32.mrf.mxu1 }
 0x167   :  { %v981_v58 = vpop.f32.mrf.mxu0 }
 0x168   :  { %v1022_v59 = vpop.f32.mrf.mxu1  ;;  %v982_v61 = vadd.f32 %v981_v58, %v941_v57 }
 0x169   :  { %v983_v62 = vpop.f32.mrf.mxu0 }
 0x16a   :  { %v1024_v63 = vpop.f32.mrf.mxu1  ;;  %v1023_v0 = vadd.f32 %v1022_v59, %v982_v61  ;;  %v984_v1 = vadd.f32 %v983_v62, %v943_v60 }
 0x16b   :  { %v985_v2 = vpop.f32.mrf.mxu0 }
 0x16c   :  { %v1026_v3 = vpop.f32.mrf.mxu1  ;;  %v1025_v4 = vadd.f32 %v1024_v63, %v984_v1  ;;  %v1029_v5 = vmax.f32 %v1023_v0, 0.0 }
 0x16d   :  { %v986_v6 = vpop.f32.mrf.mxu0 }
 0x16e   :  { %v1027_v7 = vpop.f32.mrf.mxu1  ;;  %v1030_v8 = vmax.f32 %v1025_v4, 0.0  ;;  %v1031_v10 = vpack.c.bf16 %v1029_v5, %v1029_v5 }
 0x170   :  { %v1032_v9 = vpack.c.bf16 %v1030_v8, %v1030_v8 }
 0x172   :  { %1200 = vmatprep.mubr.bf16.mxu0 %v1032_v9 }
 0x173   :  { %1201 = vmatmul.mubr.bf16.vlgmr.msra.gmra.mxu0 %v1031_v10 }
 0x233   :  { %v1386_v11 = vpop.f32.mrf.mxu0 }
 0x235   :  { %v1387_v13 = vpop.f32.mrf.mxu0 }
 0x236   :  { %v1388_v14 = vadd.f32 %v1387_v13, %v1386_v11 }
 0x237   :  { %v1389_v15 = vpop.f32.mrf.mxu0 }
 0x238   :  { %v1203_v16 = vadd.f32 %v1388_v14, %v1353_v12 }
 0x239   :  { %v1390_v17 = vpop.f32.mrf.mxu0 }
 0x23a   :  { %1208 = vst [vmem:[#allocation8] sm:$0xff] %v1203_v16 }
 0x23b   :  { %1679 = shalt.err (!%p1676_p5)
}
 0x23c   :  { %1218 = dma.vmem_to_hbm [thread:$0]  %s1216_s13, 128, %s1755_s5, [#allocation4]  }
 0x23d   :  { %1692 = dma.done.wait [#allocation4], 128  }
 0x23e   :  { %1693 = vsyncadd [#allocation4], 4294967168 }
 0x23f   :  { %1222 = vsyncpa [#allocation3], 1 }
 0x240   :  { %1223 = vsyncpa [#allocation6], 1 }
 0x241   :  { %1224 = vsyncpa [#allocation4], 1 }

</bundles_post_ra>
